<compile_context>
chip_gen: v7x
topology: tpu7x:2x2x1
jax: 0.10.0
libtpu: 0.0.40
codegen_flags: <defaults>
</compile_context>

<pallas_src>
import jax
import jax.numpy as jnp
from jax.experimental import pallas as pl
from jax.experimental.pallas import tpu as pltpu

IMG_DIM = 28 * 28 * 1  # 784
H1, H2, H3, OUT = 256, 128, 64, 1
NEG_SLOPE = 0.1  # matches nn.LeakyReLU(0.1) in the reference module

# ~15 MiB of double-buffered x either way (2 * tb * 896 lanes * bytes); activations,
# weights and output blocks bring the total to ~25-30 MiB, inside the raised limit on
# v5e/v6e (128 MiB physical VMEM) and v7x (64 MiB physical).
DEFAULT_TILE_F32 = 2048
DEFAULT_TILE_BF16 = 4096
VMEM_LIMIT_BYTES = 48 * 1024 * 1024


def _leaky_relu(x):
    return jnp.where(x > 0, x, NEG_SLOPE * x)


def disc_kernel(x_ref,
                w1_ref, b1_ref,
                w2_ref, b2_ref,
                w3_ref, b3_ref,
                w4_ref, b4_ref,
                o_ref):
    """Four Linear layers + LeakyReLU(0.1) + Sigmoid, fused in-VMEM for one batch tile."""
    bf16 = jnp.bfloat16

    # x may arrive as f32 or bf16; the cast is a no-op for bf16 callers.
    x = x_ref[...].astype(bf16)

    # Layer 1: (tb, 784) @ (784, 256) — bf16 operands, f32 accumulate.
    h = jnp.dot(x, w1_ref[...], preferred_element_type=jnp.float32) + b1_ref[...]
    h = _leaky_relu(h)

    # Layer 2: (tb, 256) @ (256, 128)
    h = jnp.dot(h.astype(bf16), w2_ref[...], preferred_element_type=jnp.float32) + b2_ref[...]
    h = _leaky_relu(h)

    # Layer 3: (tb, 128) @ (128, 64)
    h = jnp.dot(h.astype(bf16), w3_ref[...], preferred_element_type=jnp.float32) + b3_ref[...]
    h = _leaky_relu(h)

    # Layer 4 (64 -> 1): VPU multiply + lane reduce instead of an N=1 MXU matmul.
    # w4_ref is the f32 weight row-vector (1, 64); b4_ref is (1, 1).
    logit = jnp.sum(h * w4_ref[...], axis=-1, keepdims=True) + b4_ref[...]

    o_ref[...] = jax.nn.sigmoid(logit).astype(o_ref.dtype)
    # TODO(synk): a lane-dense (1, tb) output block (transposing the (tb,1) logit onto
    # lanes) would shave ~2 MiB of lane-padded output VMEM and the masked vst; kept as
    # (tb,1) since those costs hide under the x DMA and the transpose adds lowering risk.


def discriminator_forward(x, params, *, batch_tile=None):
    """x: (B, IMG_DIM) float32 or bfloat16.  Returns (B, 1) float32 in [0, 1]."""
    (w1, b1), (w2, b2), (w3, b3), (w4, b4) = params
    B, D = x.shape
    assert D == IMG_DIM

    bf16 = jnp.bfloat16
    # Pre-cast matmul weights to bf16 once (no-op if params are already bf16): halves
    # resident weight VMEM / DMA and removes per-grid-step casts inside the kernel.
    w1 = w1.astype(bf16)
    w2 = w2.astype(bf16)
    w3 = w3.astype(bf16)
    # Final-layer weight as an f32 (1, 64) row vector for the in-kernel VPU reduction.
    w4_row = w4.reshape(1, H3).astype(jnp.float32)
    b1 = b1.reshape(1, H1).astype(jnp.float32)
    b2 = b2.reshape(1, H2).astype(jnp.float32)
    b3 = b3.reshape(1, H3).astype(jnp.float32)
    b4 = b4.reshape(1, OUT).astype(jnp.float32)

    # Batch tile: constant ~15 MiB of double-buffered x regardless of dtype.
    if batch_tile is None:
        batch_tile = DEFAULT_TILE_BF16 if x.dtype == bf16 else DEFAULT_TILE_F32
    tb = min(int(batch_tile), B)
    if tb < B:
        # Tiled case: tile must be a sublane multiple; boundary block is clipped.
        tb = max(8, (tb // 8) * 8)
    n_tiles = pl.cdiv(B, tb)

    # Weight/bias index maps are constant, so the pipeline keeps them resident and
    # never re-fetches them across grid steps.
    def full(arr):
        return pl.BlockSpec(arr.shape, lambda i: (0,) * arr.ndim)

    grid_spec = pltpu.PrefetchScalarGridSpec(
        num_scalar_prefetch=0,
        grid=(n_tiles,),
        in_specs=[
            pl.BlockSpec((tb, IMG_DIM), lambda i: (i, 0)),   # x (pipelined over batch)
            full(w1), full(b1),
            full(w2), full(b2),
            full(w3), full(b3),
            full(w4_row), full(b4),
        ],
        out_specs=pl.BlockSpec((tb, OUT), lambda i: (i, 0)),
    )

    return pl.pallas_call(
        disc_kernel,
        out_shape=jax.ShapeDtypeStruct((B, OUT), jnp.float32),
        grid_spec=grid_spec,
        compiler_params=pltpu.CompilerParams(
            dimension_semantics=("parallel",),        # shards batch tiles across v7x TCs
            vmem_limit_bytes=VMEM_LIMIT_BYTES),       # cover the larger batch tile
    )(x, w1, b1, w2, b2, w3, b3, w4_row, b4)


def init_params(key):
    """Deterministic init mimicking PyTorch Linear default (U(-1/sqrt(fan_in), +))."""
    dims = [(IMG_DIM, H1), (H1, H2), (H2, H3), (H3, OUT)]
    params = []
    for (fan_in, fan_out) in dims:
        key, kw, kb = jax.random.split(key, 3)
        bound = 1.0 / (fan_in ** 0.5)
        w = jax.random.uniform(kw, (fan_in, fan_out), jnp.float32, -bound, bound)
        b = jax.random.uniform(kb, (1, fan_out), jnp.float32, -bound, bound)
        params.append((w, b))
    return params


def reference_forward(x, params):
    """Pure-JAX f32 reference matching the PyTorch module."""
    h = x
    for i, (w, b) in enumerate(params):
        h = h @ w + b
        if i < 3:
            h = jnp.where(h > 0, h, NEG_SLOPE * h)
    return jax.nn.sigmoid(h)


if __name__ == "__main__":
    key = jax.random.PRNGKey(0)
    kp, kx = jax.random.split(key)
    params = init_params(kp)

    # 1) Small batch, single grid step, f32 activations.
    B = 8
    x = jax.random.normal(kx, (B, IMG_DIM), jnp.float32)
    out = jax.block_until_ready(discriminator_forward(x, params))
    ref = reference_forward(x, params)
    assert out.shape == (B, OUT)
    assert bool(jnp.all((out >= 0.0) & (out <= 1.0)))
    # bf16 MXU operands with f32 accumulate -> loosened tolerance vs f32 reference.
    assert jnp.allclose(out, ref, atol=3e-2, rtol=3e-2), "mismatch vs f32 reference"

    # 2) Ragged batch: multi-step pipelined grid with a clipped boundary block (no jnp.pad).
    B2 = 20
    x2 = jax.random.normal(jax.random.PRNGKey(1), (B2, IMG_DIM), jnp.float32)
    out2 = jax.block_until_ready(discriminator_forward(x2, params, batch_tile=8))
    ref2 = reference_forward(x2, params)
    assert out2.shape == (B2, OUT)
    assert bool(jnp.all((out2 >= 0.0) & (out2 <= 1.0)))
    assert jnp.allclose(out2, ref2, atol=3e-2, rtol=3e-2), "mismatch (ragged batch)"

    # 3) bf16 activations (recommended production path: halves the HBM-bound x stream),
    #    multi-tile grid with a ragged tail.
    B3 = 24
    x3 = jax.random.normal(jax.random.PRNGKey(2), (B3, IMG_DIM), jnp.float32).astype(jnp.bfloat16)
    out3 = jax.block_until_ready(discriminator_forward(x3, params, batch_tile=16))
    ref3 = reference_forward(x3.astype(jnp.float32), params)
    assert out3.shape == (B3, OUT)
    assert bool(jnp.all((out3 >= 0.0) & (out3 <= 1.0)))
    assert jnp.allclose(out3, ref3, atol=5e-2, rtol=5e-2), "mismatch (bf16 activations)"

    print("KERNEL_OK")
</pallas_src>

<mosaic_0001>
module attributes {stable_mosaic.version = 11 : i64} {
  func.func @disc_kernel(%arg0: i32, %arg1: memref<8x784xf32, #tpu.memory_space<vmem>>, %arg2: memref<784x256xbf16, #tpu.memory_space<vmem>>, %arg3: memref<1x256xf32, #tpu.memory_space<vmem>>, %arg4: memref<256x128xbf16, #tpu.memory_space<vmem>>, %arg5: memref<1x128xf32, #tpu.memory_space<vmem>>, %arg6: memref<128x64xbf16, #tpu.memory_space<vmem>>, %arg7: memref<1x64xf32, #tpu.memory_space<vmem>>, %arg8: memref<1x64xf32, #tpu.memory_space<vmem>>, %arg9: memref<1x1xf32, #tpu.memory_space<vmem>>, %arg10: memref<8x1xf32, #tpu.memory_space<vmem>>) attributes {dimension_semantics = [#tpu.dimension_semantics<parallel>], iteration_bounds = array<i64: 1>, scalar_prefetch = 0 : i64, scratch_operands = 0 : i64, tpu.core_type = #tpu.core_type<tc>, window_params = [{transform_indices = @transform_0, window_bounds = array<i64: 8, 784>}, {pipeline_mode = #tpu.pipeline_mode<synchronous>, transform_indices = @transform_1, window_bounds = array<i64: 784, 256>}, {pipeline_mode = #tpu.pipeline_mode<synchronous>, transform_indices = @transform_2, window_bounds = array<i64: 1, 256>}, {pipeline_mode = #tpu.pipeline_mode<synchronous>, transform_indices = @transform_3, window_bounds = array<i64: 256, 128>}, {pipeline_mode = #tpu.pipeline_mode<synchronous>, transform_indices = @transform_4, window_bounds = array<i64: 1, 128>}, {pipeline_mode = #tpu.pipeline_mode<synchronous>, transform_indices = @transform_5, window_bounds = array<i64: 128, 64>}, {pipeline_mode = #tpu.pipeline_mode<synchronous>, transform_indices = @transform_6, window_bounds = array<i64: 1, 64>}, {pipeline_mode = #tpu.pipeline_mode<synchronous>, transform_indices = @transform_7, window_bounds = array<i64: 1, 64>}, {pipeline_mode = #tpu.pipeline_mode<synchronous>, transform_indices = @transform_8, window_bounds = array<i64: 1, 1>}, {transform_indices = @transform_9, window_bounds = array<i64: 8, 1>}]} {
    %c0 = arith.constant 0 : index
    %c0_0 = arith.constant 0 : index
    %0 = vector.load %arg1[%c0, %c0_0] : memref<8x784xf32, #tpu.memory_space<vmem>>, vector<8x784xf32>
    %1 = arith.truncf %0 : vector<8x784xf32> to vector<8x784xbf16>
    %c0_1 = arith.constant 0 : index
    %c0_2 = arith.constant 0 : index
    %2 = vector.load %arg2[%c0_1, %c0_2] : memref<784x256xbf16, #tpu.memory_space<vmem>>, vector<784x256xbf16>
    %cst = arith.constant dense<0.000000e+00> : vector<8x256xf32>
    %3 = tpu.matmul %1, %2, %cst {dimension_numbers = #tpu.dot_dimension_numbers<[1], [0], [0], [1], [0, 0, 1, 1], [], []>} : vector<8x784xbf16>, vector<784x256xbf16>, vector<8x256xf32> -> vector<8x256xf32>
    %c0_3 = arith.constant 0 : index
    %c0_4 = arith.constant 0 : index
    %4 = vector.load %arg3[%c0_3, %c0_4] : memref<1x256xf32, #tpu.memory_space<vmem>>, vector<1x256xf32>
    %5 = vector.broadcast %4 : vector<1x256xf32> to vector<8x256xf32>
    %6 = arith.addf %3, %5 : vector<8x256xf32>
    %cst_5 = arith.constant 0.000000e+00 : f32
    %7 = vector.broadcast %cst_5 : f32 to vector<8x256xf32>
    %8 = arith.cmpf ogt, %6, %7 : vector<8x256xf32>
    %cst_6 = arith.constant 1.000000e-01 : f32
    %9 = vector.broadcast %cst_6 : f32 to vector<8x256xf32>
    %10 = arith.mulf %9, %6 : vector<8x256xf32>
    %11 = arith.select %8, %6, %10 : vector<8x256xi1>, vector<8x256xf32>
    %12 = arith.truncf %11 : vector<8x256xf32> to vector<8x256xbf16>
    %c0_7 = arith.constant 0 : index
    %c0_8 = arith.constant 0 : index
    %13 = vector.load %arg4[%c0_7, %c0_8] : memref<256x128xbf16, #tpu.memory_space<vmem>>, vector<256x128xbf16>
    %cst_9 = arith.constant dense<0.000000e+00> : vector<8x128xf32>
    %14 = tpu.matmul %12, %13, %cst_9 {dimension_numbers = #tpu.dot_dimension_numbers<[1], [0], [0], [1], [0, 0, 1, 1], [], []>} : vector<8x256xbf16>, vector<256x128xbf16>, vector<8x128xf32> -> vector<8x128xf32>
    %c0_10 = arith.constant 0 : index
    %c0_11 = arith.constant 0 : index
    %15 = vector.load %arg5[%c0_10, %c0_11] : memref<1x128xf32, #tpu.memory_space<vmem>>, vector<1x128xf32>
    %16 = vector.broadcast %15 : vector<1x128xf32> to vector<8x128xf32>
    %17 = arith.addf %14, %16 : vector<8x128xf32>
    %cst_12 = arith.constant 0.000000e+00 : f32
    %18 = vector.broadcast %cst_12 : f32 to vector<8x128xf32>
    %19 = arith.cmpf ogt, %17, %18 : vector<8x128xf32>
    %cst_13 = arith.constant 1.000000e-01 : f32
    %20 = vector.broadcast %cst_13 : f32 to vector<8x128xf32>
    %21 = arith.mulf %20, %17 : vector<8x128xf32>
    %22 = arith.select %19, %17, %21 : vector<8x128xi1>, vector<8x128xf32>
    %23 = arith.truncf %22 : vector<8x128xf32> to vector<8x128xbf16>
    %c0_14 = arith.constant 0 : index
    %c0_15 = arith.constant 0 : index
    %24 = vector.load %arg6[%c0_14, %c0_15] : memref<128x64xbf16, #tpu.memory_space<vmem>>, vector<128x64xbf16>
    %cst_16 = arith.constant dense<0.000000e+00> : vector<8x64xf32>
    %25 = tpu.matmul %23, %24, %cst_16 {dimension_numbers = #tpu.dot_dimension_numbers<[1], [0], [0], [1], [0, 0, 1, 1], [], []>} : vector<8x128xbf16>, vector<128x64xbf16>, vector<8x64xf32> -> vector<8x64xf32>
    %c0_17 = arith.constant 0 : index
    %c0_18 = arith.constant 0 : index
    %26 = vector.load %arg7[%c0_17, %c0_18] : memref<1x64xf32, #tpu.memory_space<vmem>>, vector<1x64xf32>
    %27 = vector.broadcast %26 : vector<1x64xf32> to vector<8x64xf32>
    %28 = arith.addf %25, %27 : vector<8x64xf32>
    %cst_19 = arith.constant 0.000000e+00 : f32
    %29 = vector.broadcast %cst_19 : f32 to vector<8x64xf32>
    %30 = arith.cmpf ogt, %28, %29 : vector<8x64xf32>
    %cst_20 = arith.constant 1.000000e-01 : f32
    %31 = vector.broadcast %cst_20 : f32 to vector<8x64xf32>
    %32 = arith.mulf %31, %28 : vector<8x64xf32>
    %33 = arith.select %30, %28, %32 : vector<8x64xi1>, vector<8x64xf32>
    %c0_21 = arith.constant 0 : index
    %c0_22 = arith.constant 0 : index
    %34 = vector.load %arg8[%c0_21, %c0_22] : memref<1x64xf32, #tpu.memory_space<vmem>>, vector<1x64xf32>
    %35 = vector.broadcast %34 : vector<1x64xf32> to vector<8x64xf32>
    %36 = arith.mulf %33, %35 : vector<8x64xf32>
    %cst_23 = arith.constant dense<0.000000e+00> : vector<8xf32>
    %37 = vector.multi_reduction <add>, %36, %cst_23 [1] : vector<8x64xf32> to vector<8xf32>
    %38 = vector.shape_cast %37 : vector<8xf32> to vector<8x1xf32>
    %c0_24 = arith.constant 0 : index
    %c0_25 = arith.constant 0 : index
    %39 = vector.load %arg9[%c0_24, %c0_25] : memref<1x1xf32, #tpu.memory_space<vmem>>, vector<1x1xf32>
    %40 = vector.broadcast %39 : vector<1x1xf32> to vector<8x1xf32>
    %41 = arith.addf %38, %40 : vector<8x1xf32>
    %42 = arith.negf %41 : vector<8x1xf32>
    %43 = math.exp %42 : vector<8x1xf32>
    %cst_26 = arith.constant 1.000000e+00 : f32
    %44 = vector.broadcast %cst_26 : f32 to vector<8x1xf32>
    %45 = arith.addf %44, %43 : vector<8x1xf32>
    %46 = arith.divf %44, %45 : vector<8x1xf32>
    %c0_27 = arith.constant 0 : index
    %c0_28 = arith.constant 0 : index
    %47 = vector.load %arg10[%c0_27, %c0_28] : memref<8x1xf32, #tpu.memory_space<vmem>>, vector<8x1xf32>
    tpu.vector_store %arg10[%c0_27, %c0_28], %46 {strides = array<i32>} : memref<8x1xf32, #tpu.memory_space<vmem>>, vector<8x1xf32>,
    return
  }
  func.func @transform_0(%arg0: i32) -> (i32, i32) {
    %c0_i32 = arith.constant 0 : i32
    %c0_i32_0 = arith.constant 0 : i32
    return %arg0, %c0_i32 : i32, i32
  }
  func.func @transform_1(%arg0: i32) -> (i32, i32) {
    %c0_i32 = arith.constant 0 : i32
    %c0_i32_0 = arith.constant 0 : i32
    %c0_i32_1 = arith.constant 0 : i32
    return %c0_i32, %c0_i32_0 : i32, i32
  }
  func.func @transform_2(%arg0: i32) -> (i32, i32) {
    %c0_i32 = arith.constant 0 : i32
    %c0_i32_0 = arith.constant 0 : i32
    %c0_i32_1 = arith.constant 0 : i32
    return %c0_i32, %c0_i32_0 : i32, i32
  }
  func.func @transform_3(%arg0: i32) -> (i32, i32) {
    %c0_i32 = arith.constant 0 : i32
    %c0_i32_0 = arith.constant 0 : i32
    %c0_i32_1 = arith.constant 0 : i32
    return %c0_i32, %c0_i32_0 : i32, i32
  }
  func.func @transform_4(%arg0: i32) -> (i32, i32) {
    %c0_i32 = arith.constant 0 : i32
    %c0_i32_0 = arith.constant 0 : i32
    %c0_i32_1 = arith.constant 0 : i32
    return %c0_i32, %c0_i32_0 : i32, i32
  }
  func.func @transform_5(%arg0: i32) -> (i32, i32) {
    %c0_i32 = arith.constant 0 : i32
    %c0_i32_0 = arith.constant 0 : i32
    %c0_i32_1 = arith.constant 0 : i32
    return %c0_i32, %c0_i32_0 : i32, i32
  }
  func.func @transform_6(%arg0: i32) -> (i32, i32) {
    %c0_i32 = arith.constant 0 : i32
    %c0_i32_0 = arith.constant 0 : i32
    %c0_i32_1 = arith.constant 0 : i32
    return %c0_i32, %c0_i32_0 : i32, i32
  }
  func.func @transform_7(%arg0: i32) -> (i32, i32) {
    %c0_i32 = arith.constant 0 : i32
    %c0_i32_0 = arith.constant 0 : i32
    %c0_i32_1 = arith.constant 0 : i32
    return %c0_i32, %c0_i32_0 : i32, i32
  }
  func.func @transform_8(%arg0: i32) -> (i32, i32) {
    %c0_i32 = arith.constant 0 : i32
    %c0_i32_0 = arith.constant 0 : i32
    %c0_i32_1 = arith.constant 0 : i32
    return %c0_i32, %c0_i32_0 : i32, i32
  }
  func.func @transform_9(%arg0: i32) -> (i32, i32) {
    %c0_i32 = arith.constant 0 : i32
    %c0_i32_0 = arith.constant 0 : i32
    return %arg0, %c0_i32 : i32, i32
  }
}

</mosaic_0001>

<bundles_post_ra>
// kernel: tpu_custom_call.1
= control target key start
LH: loop header
LB: loop body
LE: loop exit
PB: predicated region body
PF: predicated region fallthrough
CT: control target
= control target key end

     0   :  { %s1749_s0 = inlined_call_operand.vmem [shape: f32[8,784], index: 0, kind: input, shape index: {}]   ;;  %s1750_s1 = inlined_call_operand.hbm [shape: bf16[784,256], index: 1, kind: input, shape index: {}]   ;;  %s1751_s2 = inlined_call_operand.vmem [shape: f32[1,256], index: 2, kind: input, shape index: {}]   ;;  %s1752_s3 = inlined_call_operand.hbm [shape: bf16[256,128], index: 3, kind: input, shape index: {}]   ;;  %s1753_s4 = inlined_call_operand.vmem [shape: f32[1,128], index: 4, kind: input, shape index: {}]   ;;  %s1754_s5 = inlined_call_operand.vmem [shape: bf16[128,64], index: 5, kind: input, shape index: {}]   ;;  %s1755_s6 = inlined_call_operand.vmem [shape: f32[1,64], index: 6, kind: input, shape index: {}]   ;;  %s1756_s7 = inlined_call_operand.vmem [shape: f32[1,64], index: 7, kind: input, shape index: {}]   ;;  %s1757_s8 = inlined_call_operand.<no memory space> [shape: f32[1,1], index: 8, kind: input, shape index: {}]   ;;  %s1758_s9 = inlined_call_operand.vmem [shape: f32[8,1], index: 9, kind: output, shape index: {}]  }
   0x1   :  { %v14_v0 = vstv %s1757_s8 }
   0x2   :  { %15 = vst [vmem:[#allocation2] sm:$0x1] %v14_v0 }
   0x3   :  { %16 = vsyncpa [#allocation4], 0 }
   0x4   :  { %17 = vsyncpa [#allocation6], 0  ;;  %s1603_s11 = smov [#allocation3]   ;;  %s1555_s15 = scalar_lea.hbm %s1750_s1, 12544 }
   0x5   :  { %s25_s12 = sshll.u32 %s1603_s11, 4  ;;  %p1556_p0 = scmp.ne.s32.totalorder %s1750_s1, %s1555_s15  ;;  %s26_s12 = int_to_ptr.vmem [resolvable:$true] %s25_s12 }
   0x6   :  { %p1559_p1 = scmp.lt.u32.totalorder %s1555_s15, %s1750_s1 }
   0x8   :  { %p1561_p2 = pnand %p1559_p1, %p1556_p0 }
   0xa   :  { %1564 = shalt.err (!%p1561_p2)
}
   0xb   :  { %s1565_s8 = scalar_lea.vmem %s26_s12, 12544  ;;  %p1570_p4 = scmp.lt.s32.totalorder %s26_s12, %s26_s12 }
   0xc   :  { %p1566_p3 = scmp.ne.s32.totalorder %s26_s12, %s1565_s8  ;;  %p1571_p5 = scmp.lt.s32.totalorder %s1565_s8, %s1565_s8 }
   0xe   :  { %p1572_p6 = por %p1571_p5, %p1570_p4 }
  0x10   :  { %p1573_p7 = pnand %p1572_p6, %p1566_p3 }
  0x12   :  { %1576 = shalt.err (!%p1573_p7)
}
  0x13   :  { %s1604_s20 = smov 128   ;;  %s1605_s21 = smov 8  }
  0x14   :  { %31 = dma.hbm_to_vmem [thread:$0]  %s1750_s1, 12544, %s26_s12, [#allocation4], %s1604_s20, %s1604_s20, %s1605_s21  }
  0x15   :  { %s1606_s24 = smov [#allocation5]   ;;  %s1577_s28 = scalar_lea.hbm %s1752_s3, 2048 }
  0x16   :  { %s39_s25 = sshll.u32 %s1606_s24, 4  ;;  %p1578_p8 = scmp.ne.s32.totalorder %s1752_s3, %s1577_s28  ;;  %s40_s25 = int_to_ptr.vmem [resolvable:$true] %s39_s25 }
  0x17   :  { %p1581_p9 = scmp.lt.u32.totalorder %s1577_s28, %s1752_s3 }
  0x19   :  { %p1583_p10 = pnand %p1581_p9, %p1578_p8 }
  0x1b   :  { %1586 = shalt.err (!%p1583_p10)
}
  0x1c   :  { %s1587_s13 = scalar_lea.vmem %s40_s25, 2048  ;;  %p1592_p12 = scmp.lt.s32.totalorder %s40_s25, %s40_s25 }
  0x1d   :  { %p1588_p11 = scmp.ne.s32.totalorder %s40_s25, %s1587_s13  ;;  %p1593_p13 = scmp.lt.s32.totalorder %s1587_s13, %s1587_s13 }
  0x1f   :  { %p1594_p0 = por %p1593_p13, %p1592_p12 }
  0x21   :  { %p1595_p1 = pnand %p1594_p0, %p1588_p11 }
  0x23   :  { %1598 = shalt.err (!%p1595_p1)
}
  0x24   :  { %s1607_s1 = smov 64   ;;  %s1608_s12 = smov 4  }
  0x25   :  { %45 = dma.hbm_to_vmem [thread:$0]  %s1752_s3, 2048, %s40_s25, [#allocation6], %s1607_s1, %s1607_s1, %s1608_s12  }
  0x26   :  { %1599 = dma.done.wait [#allocation4], 12544  }
  0x27   :  { %1600 = vsyncadd [#allocation4], 4294954752 }
  0x28   :  { %1601 = dma.done.wait [#allocation6], 2048  }
  0x29   :  { %1602 = vsyncadd [#allocation6], 4294965248  ;;  %v1380_v1 = vld [vmem:[#allocation3 + $0x104] ss:$8 sps:$4 sm:$0xff]   ;;  %v1382_v2 = vld [vmem:[#allocation3 + $0x100] ss:$8 sps:$4 sm:$0xff]  }
  0x2a   :  { %722 = vmatprep.subr.bf16.mxu0 %v1380_v1  ;;  %v1383_v3 = vld [vmem:[#allocation3 + $0x114] ss:$8 sps:$4 sm:$0xff]   ;;  %v1385_v4 = vld [vmem:[#allocation3 + $0x110] ss:$8 sps:$4 sm:$0xff]   ;;  %v1386_v5 = vld [vmem:[#allocation3 + $0x124] ss:$8 sps:$4 sm:$0xff]  }
  0x2b   :  { %723 = vmatpush1.bf16.msra.mxu0 %v1382_v2  ;;  %v1388_v6 = vld [vmem:[#allocation3 + $0x120] ss:$8 sps:$4 sm:$0xff]   ;;  %v1389_v7 = vld [vmem:[#allocation3 + $0x134] ss:$8 sps:$4 sm:$0xff]   ;;  %v1391_v8 = vld [vmem:[#allocation3 + $0x130] ss:$8 sps:$4 sm:$0xff]  }
  0x2c   :  { %724 = vmatprep.subr.bf16.mxu0 %v1383_v3  ;;  %v1392_v9 = vld [vmem:[#allocation3 + $0x144] ss:$8 sps:$4 sm:$0xff]   ;;  %v1394_v10 = vld [vmem:[#allocation3 + $0x140] ss:$8 sps:$4 sm:$0xff]   ;;  %v1395_v11 = vld [vmem:[#allocation3 + $0x154] ss:$8 sps:$4 sm:$0xff]  }
  0x2d   :  { %v1397_v12 = vld [vmem:[#allocation3 + $0x150] ss:$8 sps:$4 sm:$0xff]   ;;  %v1398_v13 = vld [vmem:[#allocation3 + $0x164] ss:$8 sps:$4 sm:$0xff]   ;;  %v1400_v16 = vld [vmem:[#allocation3 + $0x160] ss:$8 sps:$4 sm:$0xff]  }
  0x2e   :  { %v66_v14 = vld [vmem:[%s1749_s0 + $0x18] sm:$0xff]  ;;  %v1434_v18 = vld [vmem:[#allocation3 + $0x4] ss:$8 sps:$4 sm:$0xff]   ;;  %v1439_v21 = vld [vmem:[#allocation3] ss:$8 sps:$4 sm:$0xff]   ;;  %vm677_vm0 = vcmask 130048  }
  0x2f   :  { %725 = vmatpush1.bf16.msra.mxu0 %v1385_v4  ;;  %v73_v15 = vpack.c.bf16 %v66_v14, %v66_v14  ;;  %v1401_v17 = vld [vmem:[#allocation3 + $0x174] ss:$8 sps:$4 sm:$0xff]   ;;  %v1403_v19 = vld [vmem:[#allocation3 + $0x170] ss:$8 sps:$4 sm:$0xff]   ;;  %v1404_v20 = vld [vmem:[#allocation3 + $0x184] ss:$8 sps:$4 sm:$0xff]   ;;  %681 = vmatprep.subr.bf16.mxu1 %v1434_v18 }
  0x30   :  { %726 = vmatprep.subr.bf16.mxu0 %v1386_v5  ;;  %v1440_v22 = vld [vmem:[#allocation3 + $0x14] ss:$8 sps:$4 sm:$0xff]   ;;  %682 = vmatpush1.bf16.msra.mxu1 %v1439_v21  ;;  %v1445_v23 = vld [vmem:[#allocation3 + $0x10] ss:$8 sps:$4 sm:$0xff]   ;;  %v1446_v24 = vld [vmem:[#allocation3 + $0x24] ss:$8 sps:$4 sm:$0xff]  }
  0x31   :  { %754 = vmatprep.mubr.bf16.mxu0 %v73_v15  ;;  %683 = vmatprep.subr.bf16.mxu1 %v1440_v22  ;;  %v1406_v25 = vld [vmem:[#allocation3 + $0x180] ss:$8 sps:$4 sm:$0xff]   ;;  %v1407_v26 = vld [vmem:[#allocation3 + $0x194] ss:$8 sps:$4 sm:$0xff]   ;;  %v1409_v29 = vld [vmem:[#allocation3 + $0x190] ss:$8 sps:$4 sm:$0xff]  }
  0x32   :  { %v1451_v27 = vld [vmem:[#allocation3 + $0x20] ss:$8 sps:$4 sm:$0xff]   ;;  %v1452_v28 = vld [vmem:[#allocation3 + $0x34] ss:$8 sps:$4 sm:$0xff]   ;;  %v1410_v30 = vld [vmem:[#allocation3 + $0x1a4] ss:$8 sps:$4 sm:$0xff]  }
  0x33   :  { %727 = vmatpush1.bf16.msra.mxu0 %v1388_v6  ;;  %v1457_v31 = vld [vmem:[#allocation3 + $0x30] ss:$8 sps:$4 sm:$0xff]   ;;  %v1458_v32 = vld [vmem:[#allocation3 + $0x44] ss:$8 sps:$4 sm:$0xff]   ;;  %v1412_v33 = vld [vmem:[#allocation3 + $0x1a0] ss:$8 sps:$4 sm:$0xff]  }
  0x34   :  { %728 = vmatprep.subr.bf16.mxu0 %v1389_v7  ;;  %684 = vmatpush1.bf16.msra.mxu1 %v1445_v23  ;;  %v1413_v34 = vld [vmem:[#allocation3 + $0x1b4] ss:$8 sps:$4 sm:$0xff]   ;;  %v1463_v35 = vld [vmem:[#allocation3 + $0x40] ss:$8 sps:$4 sm:$0xff]   ;;  %v1415_v37 = vld [vmem:[#allocation3 + $0x1b0] ss:$8 sps:$4 sm:$0xff]  }
  0x35   :  { %685 = vmatprep.subr.bf16.mxu1 %v1446_v24  ;;  %v1464_v36 = vld [vmem:[#allocation3 + $0x54] ss:$8 sps:$4 sm:$0xff]   ;;  %v1416_v38 = vld [vmem:[#allocation3 + $0x1c4] ss:$8 sps:$4 sm:$0xff]   ;;  %v1469_v39 = vld [vmem:[#allocation3 + $0x50] ss:$8 sps:$4 sm:$0xff]  }
  0x36   :  { %v1470_v40 = vld [vmem:[#allocation3 + $0x64] ss:$8 sps:$4 sm:$0xff]   ;;  %v1418_v41 = vld [vmem:[#allocation3 + $0x1c0] ss:$8 sps:$4 sm:$0xff]   ;;  %v1419_v42 = vld [vmem:[#allocation3 + $0x1d4] ss:$8 sps:$4 sm:$0xff]  }
  0x37   :  { %729 = vmatpush1.bf16.msra.mxu0 %v1391_v8  ;;  %v1475_v43 = vld [vmem:[#allocation3 + $0x60] ss:$8 sps:$4 sm:$0xff]   ;;  %v1476_v44 = vld [vmem:[#allocation3 + $0x74] ss:$8 sps:$4 sm:$0xff]   ;;  %v1421_v45 = vld [vmem:[#allocation3 + $0x1d0] ss:$8 sps:$4 sm:$0xff]  }
  0x38   :  { %730 = vmatprep.subr.bf16.mxu0 %v1392_v9  ;;  %686 = vmatpush1.bf16.msra.mxu1 %v1451_v27  ;;  %v1422_v46 = vld [vmem:[#allocation3 + $0x1e4] ss:$8 sps:$4 sm:$0xff]   ;;  %v1481_v47 = vld [vmem:[#allocation3 + $0x70] ss:$8 sps:$4 sm:$0xff]   ;;  %v1424_v49 = vld [vmem:[#allocation3 + $0x1e0] ss:$8 sps:$4 sm:$0xff]  }
  0x39   :  { %687 = vmatprep.subr.bf16.mxu1 %v1452_v28  ;;  %v1482_v48 = vld [vmem:[#allocation3 + $0x84] ss:$8 sps:$4 sm:$0xff]   ;;  %v1425_v50 = vld [vmem:[#allocation3 + $0x1f4] ss:$8 sps:$4 sm:$0xff]   ;;  %v1487_v51 = vld [vmem:[#allocation3 + $0x80] ss:$8 sps:$4 sm:$0xff]  }
  0x3a   :  { %v1427_v52 = vld [vmem:[#allocation3 + $0x1f0] ss:$8 sps:$4 sm:$0xff]   ;;  %v1488_v53 = vld [vmem:[#allocation3 + $0x94] ss:$8 sps:$4 sm:$0xff]   ;;  %v1430_v55 = vld [vmem:[#allocation3 + $0x204] ss:$8 sps:$4 sm:$0xff]  }
  0x3b   :  { %731 = vmatpush1.bf16.msra.mxu0 %v1394_v10  ;;  %v65_v54 = vld [vmem:[%s1749_s0 + $0x10] sm:$0xff]  ;;  %v68_v59 = vld [vmem:[%s1749_s0 + $0x28] sm:$0xff]  ;;  %v63_v22 = vld [vmem:[%s1749_s0] sm:$0xff]  ;;  %vm1611_vm3 = vmmov 0   ;;  %vm1154_vm6 = vcmask 523264   ;;  %vm1172_vm7 = vcmask 7168  }
  0x3c   :  { %732 = vmatprep.subr.bf16.mxu0 %v1395_v11  ;;  %688 = vmatpush1.bf16.msra.mxu1 %v1457_v31  ;;  %v1493_v56 = vld [vmem:[#allocation3 + $0x90] ss:$8 sps:$4 sm:$0xff]   ;;  %v1494_v57 = vld [vmem:[#allocation3 + $0xa4] ss:$8 sps:$4 sm:$0xff]   ;;  %v72_v58 = vpack.c.bf16 %v65_v54, %v65_v54  ;;  %v1428_v60 = vld [vmem:[#allocation3 + $0x200] ss:$8 sps:$4 sm:$0xff]   ;;  %v75_v61 = vpack.c.bf16 %v68_v59, %v68_v59 }
  0x3d   :  { %689 = vmatprep.subr.bf16.mxu1 %v1458_v32  ;;  %v1433_v62 = vld [vmem:[#allocation3 + $0x214] ss:$8 sps:$4 sm:$0xff]   ;;  %v1499_v63 = vld [vmem:[#allocation3 + $0xa0] ss:$8 sps:$4 sm:$0xff]   ;;  %v1431_v2 = vld [vmem:[#allocation3 + $0x210] ss:$8 sps:$4 sm:$0xff]  }
  0x3e   :  { %v1500_v0 = vld [vmem:[#allocation3 + $0xb4] ss:$8 sps:$4 sm:$0xff]   ;;  %v64_v1 = vld [vmem:[%s1749_s0 + $0x8] sm:$0xff]  ;;  %v1505_v5 = vld [vmem:[#allocation3 + $0xb0] ss:$8 sps:$4 sm:$0xff]  }
  0x3f   :  { %733 = vmatpush1.bf16.msra.mxu0 %v1397_v12  ;;  %v71_v3 = vpack.c.bf16 %v64_v1, %v64_v1  ;;  %v1438_v4 = vld [vmem:[#allocation3 + $0x224] ss:$8 sps:$4 sm:$0xff]   ;;  %v1436_v7 = vld [vmem:[#allocation3 + $0x220] ss:$8 sps:$4 sm:$0xff]   ;;  %v1444_v8 = vld [vmem:[#allocation3 + $0x234] ss:$8 sps:$4 sm:$0xff]  }
  0x40   :  { %734 = vmatprep.subr.bf16.mxu0 %v1398_v13  ;;  %690 = vmatpush1.bf16.msra.mxu1 %v1463_v35  ;;  %v1506_v6 = vld [vmem:[#allocation3 + $0xc4] ss:$8 sps:$4 sm:$0xff]   ;;  %v1511_v9 = vld [vmem:[#allocation3 + $0xc0] ss:$8 sps:$4 sm:$0xff]   ;;  %v1512_v10 = vld [vmem:[#allocation3 + $0xd4] ss:$8 sps:$4 sm:$0xff]  }
  0x41   :  { %691 = vmatprep.subr.bf16.mxu1 %v1464_v36  ;;  %713 = vmatprep.mubr.bf16.mxu1 %v71_v3  ;;  %v1442_v11 = vld [vmem:[#allocation3 + $0x230] ss:$8 sps:$4 sm:$0xff]   ;;  %v1450_v12 = vld [vmem:[#allocation3 + $0x244] ss:$8 sps:$4 sm:$0xff]   ;;  %v1448_v13 = vld [vmem:[#allocation3 + $0x240] ss:$8 sps:$4 sm:$0xff]  }
  0x42   :  { %v1517_v14 = vld [vmem:[#allocation3 + $0xd0] ss:$8 sps:$4 sm:$0xff]   ;;  %v1518_v15 = vld [vmem:[#allocation3 + $0xe4] ss:$8 sps:$4 sm:$0xff]   ;;  %v1524_v18 = vld [vmem:[#allocation3 + $0xf4] ss:$8 sps:$4 sm:$0xff]  }
  0x43   :  { %735 = vmatpush1.bf16.msra.mxu0 %v1400_v16  ;;  %v1456_v16 = vld [vmem:[#allocation3 + $0x254] ss:$8 sps:$4 sm:$0xff]   ;;  %v1526_v21 = vld [vmem:[#allocation3 + $0xf0] ss:$8 sps:$4 sm:$0xff]   ;;  %v1460_v24 = vld [vmem:[#allocation3 + $0x260] ss:$8 sps:$4 sm:$0xff]  }
  0x44   :  { %736 = vmatprep.subr.bf16.mxu0 %v1401_v17  ;;  %692 = vmatpush1.bf16.msra.mxu1 %v1469_v39  ;;  %v1523_v17 = vld [vmem:[#allocation3 + $0xe0] ss:$8 sps:$4 sm:$0xff]   ;;  %v1527_v23 = vld [vmem:[#allocation5 + $0x40] sm:$0xff]   ;;  %v1529_v28 = vld [vmem:[#allocation5 + $0x48] sm:$0xff]  }
  0x45   :  { %693 = vmatprep.subr.bf16.mxu1 %v1470_v40  ;;  %v1528_v27 = vld [vmem:[#allocation5] sm:$0xff]   ;;  %v1530_v31 = vld [vmem:[#allocation5 + $0x8] sm:$0xff]   ;;  %v1531_v32 = vld [vmem:[#allocation5 + $0x50] sm:$0xff]  }
  0x46   :  { %v1532_v35 = vld [vmem:[#allocation5 + $0x10] sm:$0xff]   ;;  %v1533_v36 = vld [vmem:[#allocation5 + $0x58] sm:$0xff]   ;;  %v1535_v40 = vld [vmem:[#allocation5 + $0x60] sm:$0xff]  }
  0x47   :  { %737 = vmatpush1.bf16.msra.mxu0 %v1403_v19  ;;  %v1454_v19 = vld [vmem:[#allocation3 + $0x250] ss:$8 sps:$4 sm:$0xff]   ;;  %v1534_v39 = vld [vmem:[#allocation5 + $0x18] sm:$0xff]  }
  0x48   :  { %738 = vmatprep.subr.bf16.mxu0 %v1404_v20  ;;  %694 = vmatpush1.bf16.msra.mxu1 %v1475_v43  ;;  %v1462_v20 = vld [vmem:[#allocation3 + $0x264] ss:$8 sps:$4 sm:$0xff]   ;;  %v1536_v43 = vld [vmem:[#allocation5 + $0x20] sm:$0xff]  }
  0x49   :  { %695 = vmatprep.subr.bf16.mxu1 %v1476_v44  ;;  %v1490_v44 = vld [vmem:[#allocation3 + $0x2b0] ss:$8 sps:$4 sm:$0xff]   ;;  %v1522_v54 = vld [vmem:[#allocation3 + $0x304] ss:$8 sps:$4 sm:$0xff]  }
  0x4a   :  { %v1542_v1 = vld [vmem:[#allocation5 + $0x38] sm:$0xff]  }
  0x4b   :  { %739 = vmatpush1.bf16.msra.mxu0 %v1406_v25  ;;  %v1468_v25 = vld [vmem:[#allocation3 + $0x274] ss:$8 sps:$4 sm:$0xff]  }
  0x4c   :  { %740 = vmatprep.subr.bf16.mxu0 %v1407_v26  ;;  %696 = vmatpush1.bf16.msra.mxu1 %v1481_v47  ;;  %v70_v26 = vpack.c.bf16 %v63_v22, %v63_v22  ;;  %v1504_v47 = vld [vmem:[#allocation3 + $0x2d4] ss:$8 sps:$4 sm:$0xff]  }
  0x4d   :  { %697 = vmatprep.subr.bf16.mxu1 %v1482_v48  ;;  %v1502_v48 = vld [vmem:[#allocation3 + $0x2d0] ss:$8 sps:$4 sm:$0xff]  }
  0x4f   :  { %741 = vmatpush1.bf16.msra.mxu0 %v1409_v29  ;;  %v1466_v29 = vld [vmem:[#allocation3 + $0x270] ss:$8 sps:$4 sm:$0xff]  }
  0x50   :  { %742 = vmatprep.subr.bf16.mxu0 %v1410_v30  ;;  %698 = vmatpush1.bf16.msra.mxu1 %v1487_v51  ;;  %v1474_v30 = vld [vmem:[#allocation3 + $0x284] ss:$8 sps:$4 sm:$0xff]   ;;  %v1516_v51 = vld [vmem:[#allocation3 + $0x2f4] ss:$8 sps:$4 sm:$0xff]  }
  0x51   :  { %699 = vmatprep.subr.bf16.mxu1 %v1488_v53  ;;  %v67_v53 = vld [vmem:[%s1749_s0 + $0x20] sm:$0xff] }
  0x53   :  { %743 = vmatpush1.bf16.msra.mxu0 %v1412_v33  ;;  %v1472_v33 = vld [vmem:[#allocation3 + $0x280] ss:$8 sps:$4 sm:$0xff]  }
  0x54   :  { %744 = vmatprep.subr.bf16.mxu0 %v1413_v34  ;;  %700 = vmatpush1.bf16.msra.mxu1 %v1493_v56  ;;  %v1480_v34 = vld [vmem:[#allocation3 + $0x294] ss:$8 sps:$4 sm:$0xff]   ;;  %v1520_v56 = vld [vmem:[#allocation3 + $0x300] ss:$8 sps:$4 sm:$0xff]  }
  0x55   :  { %701 = vmatprep.subr.bf16.mxu1 %v1494_v57  ;;  %v1609_v57 = vmov 0  }
  0x57   :  { %745 = vmatpush1.bf16.msra.mxu0 %v1415_v37  ;;  %v1478_v37 = vld [vmem:[#allocation3 + $0x290] ss:$8 sps:$4 sm:$0xff]  }
  0x58   :  { %746 = vmatprep.subr.bf16.mxu0 %v1416_v38  ;;  %702 = vmatpush1.bf16.msra.mxu1 %v1499_v63  ;;  %v1486_v38 = vld [vmem:[#allocation3 + $0x2a4] ss:$8 sps:$4 sm:$0xff]  }
  0x59   :  { %703 = vmatprep.subr.bf16.mxu1 %v1500_v0  ;;  %v1540_v63 = vld [vmem:[#allocation5 + $0x30] sm:$0xff]   ;;  %v1541_v0 = vld [vmem:[#allocation5 + $0x78] sm:$0xff]  }
  0x5b   :  { %747 = vmatpush1.bf16.msra.mxu0 %v1418_v41  ;;  %v1484_v41 = vld [vmem:[#allocation3 + $0x2a0] ss:$8 sps:$4 sm:$0xff]  }
  0x5c   :  { %748 = vmatprep.subr.bf16.mxu0 %v1419_v42  ;;  %704 = vmatpush1.bf16.msra.mxu1 %v1505_v5  ;;  %v1492_v42 = vld [vmem:[#allocation3 + $0x2b4] ss:$8 sps:$4 sm:$0xff]  }
  0x5d   :  { %705 = vmatprep.subr.bf16.mxu1 %v1506_v6 }
  0x5f   :  { %749 = vmatpush1.bf16.msra.mxu0 %v1421_v45  ;;  %v1498_v45 = vld [vmem:[#allocation3 + $0x2c4] ss:$8 sps:$4 sm:$0xff]  }
  0x60   :  { %750 = vmatprep.subr.bf16.mxu0 %v1422_v46  ;;  %706 = vmatpush1.bf16.msra.mxu1 %v1511_v9  ;;  %v1496_v46 = vld [vmem:[#allocation3 + $0x2c0] ss:$8 sps:$4 sm:$0xff]  }
  0x61   :  { %707 = vmatprep.subr.bf16.mxu1 %v1512_v10  ;;  %v175_v10 = vld [vmem:[%s1751_s2] sm:$0x3] }
  0x63   :  { %751 = vmatpush1.bf16.msra.mxu0 %v1424_v49  ;;  %v1510_v49 = vld [vmem:[#allocation3 + $0x2e4] ss:$8 sps:$4 sm:$0xff]  }
  0x64   :  { %752 = vmatprep.subr.bf16.mxu0 %v1425_v50  ;;  %708 = vmatpush1.bf16.msra.mxu1 %v1517_v14  ;;  %v1508_v50 = vld [vmem:[#allocation3 + $0x2e0] ss:$8 sps:$4 sm:$0xff]  }
  0x65   :  { %709 = vmatprep.subr.bf16.mxu1 %v1518_v15 }
  0x67   :  { %753 = vmatpush1.bf16.msra.mxu0 %v1427_v52  ;;  %v1514_v52 = vld [vmem:[#allocation3 + $0x2f0] ss:$8 sps:$4 sm:$0xff]  }
  0x68   :  { %763 = vmatprep.subr.bf16.mxu0 %v1430_v55  ;;  %710 = vmatpush1.bf16.msra.mxu1 %v1523_v17  ;;  %v74_v55 = vpack.c.bf16 %v67_v53, %v67_v53  ;;  %v1305_v53 = vld [vmem:[%s1756_s7] ss:$0 sm:$0xff] }
  0x69   :  { %711 = vmatprep.subr.bf16.mxu1 %v1524_v18 }
  0x6a   :  { %755 = vmatmul.mubr.bf16.vlgmr.msra.gmra.mrb[0].mxu0 %v72_v58  ;;  %v69_v58 = vld [vmem:[%s1749_s0 + $0x30] sm:$0xff] }
  0x6b   :  { %764 = vmatpush1.bf16.msra.mxu0 %v1428_v60  ;;  %795 = vmatprep.mubr.bf16.mxu0 %v75_v61  ;;  %v76_v59 = vpack.c.bf16 %v69_v58, %v69_v58  ;;  %v1537_v60 = vld [vmem:[#allocation5 + $0x68] sm:$0xff]  }
  0x6c   :  { %765 = vmatprep.subr.bf16.mxu0 %v1433_v62  ;;  %712 = vmatpush1.bf16.msra.mxu1 %v1526_v21  ;;  %v1538_v61 = vld [vmem:[#allocation5 + $0x28] sm:$0xff]   ;;  %v1539_v62 = vld [vmem:[#allocation5 + $0x70] sm:$0xff]  }
  0x6d   :  { %1308 = vmatprep.subr.bf16.mxu1 %v1527_v23 }
  0x6f   :  { %766 = vmatpush1.bf16.msra.mxu0 %v1431_v2  ;;  %714 = vmatmul.mubr.bf16.vlgmr.msra.gmra.mrb[0].mxu1 %v70_v26  ;;  %v1610_v2 = vmov 0.0  }
  0x70   :  { %767 = vmatprep.subr.bf16.mxu0 %v1438_v4  ;;  %1309 = vmatpush3.bf16.msra.mxu1 %v1528_v27  ;;  %v1543_v27 = vld [vmem:[%s1754_s5] sm:$0xff]  }
  0x71   :  { %1310 = vmatprep.subr.bf16.mxu1 %v1529_v28 }
  0x73   :  { %768 = vmatpush1.bf16.msra.mxu0 %v1436_v7  ;;  %v177_v7 = vlaneseq }
  0x74   :  { %769 = vmatprep.subr.bf16.mxu0 %v1444_v8  ;;  %1311 = vmatpush3.bf16.msra.mxu1 %v1530_v31  ;;  %v1546_v31 = vld [vmem:[%s1754_s5 + $0x18] sm:$0xff]  }
  0x75   :  { %1312 = vmatprep.subr.bf16.mxu1 %v1531_v32  ;;  %v178_v8 = vshrl.u32 %v177_v7, 7  ;;  %v1547_v32 = vld [vmem:[%s1754_s5 + $0x20] sm:$0xff]  }
  0x77   :  { %770 = vmatpush1.bf16.msra.mxu0 %v1442_v11  ;;  %v179_v9 = vsub.s32 0, %v178_v8  ;;  %v183_v11 = vsub.s32 1, %v178_v8 }
  0x78   :  { %771 = vmatprep.subr.bf16.mxu0 %v1450_v12  ;;  %1313 = vmatpush3.bf16.msra.mxu1 %v1532_v35  ;;  %v1550_v35 = vld [vmem:[%s1754_s5 + $0x38] sm:$0xff]  }
  0x79   :  { %1314 = vmatprep.subr.bf16.mxu1 %v1533_v36  ;;  %v180_v12 = vrot.slane %v175_v10, %v179_v9 }
  0x7b   :  { %772 = vmatpush1.bf16.msra.mxu0 %v1448_v13  ;;  %v184_v13 = vrot.slane %v175_v10, %v183_v11 }
  0x7c   :  { %773 = vmatprep.subr.bf16.mxu0 %v1456_v16  ;;  %1315 = vmatpush3.bf16.msra.mxu1 %v1534_v39 }
  0x7d   :  { %1316 = vmatprep.subr.bf16.mxu1 %v1535_v40 }
  0x7f   :  { %774 = vmatpush1.bf16.msra.mxu0 %v1454_v19 }
  0x80   :  { %775 = vmatprep.subr.bf16.mxu0 %v1462_v20  ;;  %1317 = vmatpush3.bf16.msra.mxu1 %v1536_v43 }
  0x81   :  { %1318 = vmatprep.subr.bf16.mxu1 %v1537_v60 }
  0x83   :  { %776 = vmatpush1.bf16.msra.mxu0 %v1460_v24 }
  0x84   :  { %777 = vmatprep.subr.bf16.mxu0 %v1468_v25  ;;  %1319 = vmatpush3.bf16.msra.mxu1 %v1538_v61 }
  0x85   :  { %1320 = vmatprep.subr.bf16.mxu1 %v1539_v62 }
  0x87   :  { %778 = vmatpush1.bf16.msra.mxu0 %v1466_v29  ;;  %v1544_v29 = vld [vmem:[%s1754_s5 + $0x8] sm:$0xff]  }
  0x88   :  { %779 = vmatprep.subr.bf16.mxu0 %v1474_v30  ;;  %1321 = vmatpush3.bf16.msra.mxu1 %v1540_v63  ;;  %v1545_v30 = vld [vmem:[%s1754_s5 + $0x10] sm:$0xff]  }
  0x89   :  { %1322 = vmatprep.subr.bf16.mxu1 %v1541_v0 }
  0x8b   :  { %780 = vmatpush1.bf16.msra.mxu0 %v1472_v33  ;;  %v1548_v33 = vld [vmem:[%s1754_s5 + $0x28] sm:$0xff]  }
  0x8c   :  { %781 = vmatprep.subr.bf16.mxu0 %v1480_v34  ;;  %1323 = vmatpush3.bf16.msra.mxu1 %v1542_v1  ;;  %v1549_v34 = vld [vmem:[%s1754_s5 + $0x30] sm:$0xff]  }
  0x8d   :  { %1339 = vmatprep.subr.bf16.mxu1 %v1610_v2 }
  0x8f   :  { %782 = vmatpush1.bf16.msra.mxu0 %v1478_v37  ;;  %v1279_v37 = vld [vmem:[%s1753_s4] ss:$0 sm:$0xff] }
  0x90   :  { %783 = vmatprep.subr.bf16.mxu0 %v1486_v38 }
  0x93   :  { %784 = vmatpush1.bf16.msra.mxu0 %v1484_v41 }
  0x94   :  { %785 = vmatprep.subr.bf16.mxu0 %v1492_v42 }
  0x97   :  { %786 = vmatpush1.bf16.msra.mxu0 %v1490_v44 }
  0x98   :  { %787 = vmatprep.subr.bf16.mxu0 %v1498_v45 }
  0x9b   :  { %788 = vmatpush1.bf16.msra.mxu0 %v1496_v46  ;;  %v1296_v46 = vld [vmem:[%s1755_s6] ss:$0 sm:$0xff] }
  0x9c   :  { %789 = vmatprep.subr.bf16.mxu0 %v1504_v47 }
  0x9f   :  { %790 = vmatpush1.bf16.msra.mxu0 %v1502_v48 }
  0xa0   :  { %791 = vmatprep.subr.bf16.mxu0 %v1510_v49 }
  0xa3   :  { %792 = vmatpush1.bf16.msra.mxu0 %v1508_v50 }
  0xa4   :  { %793 = vmatprep.subr.bf16.mxu0 %v1516_v51 }
  0xa7   :  { %794 = vmatpush1.bf16.msra.mxu0 %v1514_v52 }
  0xa8   :  { %804 = vmatprep.subr.bf16.mxu0 %v1522_v54 }
  0xaa   :  { %796 = vmatmul.mubr.bf16.vlgmr.msra.gmra.mrb[0].mxu0 %v74_v55 }
  0xab   :  { %805 = vmatpush1.bf16.msra.mxu0 %v1520_v56  ;;  %836 = vmatprep.mubr.bf16.mxu0 %v1609_v57  ;;  %v1306_v57 = vld [vmem:[#allocation2] ss:$0 sm:$0xff] }
  0xb6   :  { %1278 = vmatmul.mubr.msk.bf16.vlgmr.msra.gmra.mrb[0].mxu0 %vm677_vm0, %v76_v59 }
 0x142   :  { %v715_v3 = vpop.f32.mrb[0].mxu1 }
 0x143   :  { %v717_v4 = vpop.f32.mrb[1].mxu1  ;;  %v716_v14 = vadd.f32 %v715_v3, %v180_v12 }
 0x144   :  { %v719_v5 = vpop.f32.mrb[2].mxu1  ;;  %v718_v15 = vadd.f32 %v717_v4, %v184_v13 }
 0x145   :  { %v720_v6 = vpop.f32.mrb[3].mxu1 }
 0x189   :  { %v838_v16 = vpop.f32.mrb[0].mxu0 }
 0x18a   :  { %v1360_v17 = vadd.f32 %v838_v16, %v716_v14  ;;  %v840_v18 = vpop.f32.mrb[1].mxu0 }
 0x18b   :  { %v1362_v19 = vadd.f32 %v840_v18, %v718_v15  ;;  %v842_v20 = vpop.f32.mrb[2].mxu0 }
 0x18c   :  { %vm845_vm1 = vcmp.gt.f32.partialorder %v1360_v17, 0.0  ;;  %v847_v21 = vmul.f32 0.1, %v1360_v17  ;;  %v843_v22 = vpop.f32.mrb[3].mxu0 }
 0x18d   :  { %vm846_vm2 = vcmp.gt.f32.partialorder %v1362_v19, 0.0  ;;  %v848_v23 = vmul.f32 0.1, %v1362_v19 }
 0x18e   :  { %v849_v24 = vsel %vm845_vm1, %v1360_v17, %v847_v21 }
 0x18f   :  { %v850_v25 = vsel %vm846_vm2, %v1362_v19, %v848_v23  ;;  %v851_v28 = vpack.c.bf16 %v849_v24, %v849_v24 }
 0x190   :  { %v852_v26 = vpack.c.bf16 %v850_v25, %v850_v25 }
 0x192   :  { %1020 = vmatprep.mubr.bf16.mxu1 %v852_v26 }
 0x193   :  { %1021 = vmatmul.mubr.bf16.vlgmr.msra.gmra.mrb[4].mxu1 %v851_v28 }
 0x194   :  { %1340 = vmatpush3.bf16.msra.mxu1 %v1543_v27  ;;  %1355 = vmatprep.mubr.msk.bf16.mxu1 %vm1611_vm3, %v1610_v2 }
 0x195   :  { %1341 = vmatprep.subr.bf16.mxu1 %v1610_v2 }
 0x198   :  { %1342 = vmatpush3.bf16.msra.mxu1 %v1544_v29 }
 0x199   :  { %1343 = vmatprep.subr.bf16.mxu1 %v1610_v2 }
 0x19c   :  { %1344 = vmatpush3.bf16.msra.mxu1 %v1545_v30 }
 0x19d   :  { %1345 = vmatprep.subr.bf16.mxu1 %v1610_v2 }
 0x1a0   :  { %1346 = vmatpush3.bf16.msra.mxu1 %v1546_v31 }
 0x1a1   :  { %1347 = vmatprep.subr.bf16.mxu1 %v1610_v2 }
 0x1a4   :  { %1348 = vmatpush3.bf16.msra.mxu1 %v1547_v32 }
 0x1a5   :  { %1349 = vmatprep.subr.bf16.mxu1 %v1610_v2 }
 0x1a8   :  { %1350 = vmatpush3.bf16.msra.mxu1 %v1548_v33 }
 0x1a9   :  { %1351 = vmatprep.subr.bf16.mxu1 %v1610_v2 }
 0x1ac   :  { %1352 = vmatpush3.bf16.msra.mxu1 %v1549_v34 }
 0x1ad   :  { %1353 = vmatprep.subr.bf16.mxu1 %v1610_v2 }
 0x1b0   :  { %1354 = vmatpush3.bf16.msra.mxu1 %v1550_v35 }
 0x266   :  { %v1324_v36 = vpop.f32.mrb[4].mxu1 }
 0x267   :  { %v1325_v38 = vpop.f32.mrb[5].mxu1 }
 0x268   :  { %v1326_v39 = vadd.f32 %v1325_v38, %v1324_v36  ;;  %v1327_v40 = vpop.f32.mrb[6].mxu1 }
 0x269   :  { %v1328_v41 = vpop.f32.mrb[7].mxu1 }
 0x26a   :  { %v1023_v42 = vadd.f32 %v1326_v39, %v1279_v37 }
 0x26c   :  { %vm1028_vm4 = vcmp.gt.f32.partialorder %v1023_v42, 0.0  ;;  %v1029_v43 = vmul.f32 0.1, %v1023_v42 }
 0x26e   :  { %v1030_v44 = vsel %vm1028_vm4, %v1023_v42, %v1029_v43 }
 0x26f   :  { %v1031_v45 = vpack.c.bf16 %v1030_v44, %v1030_v44 }
 0x271   :  { %1356 = vmatmul.mubr.bf16.vlgmr.msra.gmra.mrb[8].mxu1 %v1031_v45 }
 0x344   :  { %v1137_v47 = vpop.f32.mrb[8].mxu1 }
 0x345   :  { %v1138_v48 = vadd.f32 %v1296_v46, %v1137_v47  ;;  %v1357_v49 = vpop.f32.mrb[9].mxu1 }
 0x346   :  { %v1140_v50 = vpop.f32.mrb[10].mxu1 }
 0x347   :  { %v1144_v51 = vmul.f32 0.1, %v1138_v48  ;;  %v1358_v52 = vpop.f32.mrb[11].mxu1  ;;  %vm1143_vm5 = vcmp.gt.f32.partialorder %v1138_v48, 0.0 }
 0x349   :  { %v1145_v54 = vsel %vm1143_vm5, %v1138_v48, %v1144_v51 }
 0x34a   :  { %v1153_v55 = vmul.f32 %v1305_v53, %v1145_v54 }
 0x34c   :  { %v1155_v56 = vsel %vm1154_vm6, %v1153_v55, 0.0 }
 0x34d   :  { %1156 = vadd.xlane.f32.xlu0 %v1155_v56 }
 0x3da   :  { %v1157_v58 = vpop.xlane.xlu0 %1156 }
 0x3db   :  { %v1165_v59 = vadd.f32 %v1306_v57, %v1157_v58 }
 0x3dd   :  { %v1307_v60 = vmul.f32 -1.442695, %v1165_v59 }
 0x3df   :  { %1551 = vpow2.f32 %v1307_v60 }
 0x3e9   :  { %v1552_v61 = vpop.eup %1551 }
 0x3ea   :  { %v1169_v62 = vadd.f32 1.0, %v1552_v61 }
 0x3ec   :  { %1553 = vrcp.f32 %v1169_v62 }
 0x3f6   :  { %v1554_v63 = vpop.eup %1553 }
 0x3f7   :  { %1173 = vst.msk [vmem:[%s1758_s9] sm:$0xff] %vm1172_vm7, %v1554_v63 }
 0x3f8   :  { %1178 = vsyncpa [#allocation4], 1 }
 0x3f9   :  { %1179 = vsyncpa [#allocation6], 1 }

</bundles_post_ra>
